<compile_context>
chip_gen: v7x
topology: tpu7x:2x2x1
jax: 0.10.0
libtpu: 0.0.40
codegen_flags: <defaults>
</compile_context>

<pallas_src>
import functools

import jax
import jax.numpy as jnp
from jax.experimental import pallas as pl
from jax.experimental.pallas import tpu as pltpu

_EPS = 1e-6  # F.pairwise_distance default eps (added elementwise to the difference)


def _round_up(x, m):
    return ((x + m - 1) // m) * m


def _contrastive_loss_kernel(x1_ref, x2_ref, y_ref, out_ref, *, margin, n_total, tile_n):
    step = pl.program_id(0)

    @pl.when(step == 0)
    def _init():
        out_ref[...] = jnp.zeros_like(out_ref)

    # Cast in-kernel: inputs arrive in their native dtype (bf16 stays bf16 in HBM/DMA).
    x1 = x1_ref[...].astype(jnp.float32)              # (TN, D)
    x2 = x2_ref[...].astype(jnp.float32)              # (TN, D)
    y = y_ref[...].astype(jnp.float32)                # (TN, 1)

    diff = x1 - x2 + _EPS                             # per-element eps, as in F.pairwise_distance
    d2 = jnp.sum(diff * diff, axis=-1, keepdims=True)  # (TN, 1) squared distance (XLU reduce)
    d = jnp.sqrt(d2)                                   # EUP slot (effectively free)

    hinge = jnp.maximum(margin - d, 0.0)               # clamp(margin - d, 0, inf)
    per_row = (1.0 - y) * d2 + y * (hinge * hinge)     # reuse d2: no sqrt->square round trip

    # Mask rows beyond the true batch size (tail tile may be padded).
    row_idx = step * tile_n + jax.lax.broadcasted_iota(jnp.int32, per_row.shape, 0)
    per_row = jnp.where(row_idx < n_total, per_row, 0.0)

    out_ref[...] += jnp.sum(per_row)

    @pl.when(step == pl.num_programs(0) - 1)
    def _finalize():
        out_ref[...] = out_ref[...] * (1.0 / n_total)  # divide by true N, not padded N


def contrastive_loss(output1, output2, y, margin=2.0, max_tile_n=512):
    """Pallas TPU implementation of ContrastiveLoss.forward."""
    assert output1.shape == output2.shape and output1.ndim == 2
    n, feat = output1.shape

    # Row tile: multiple of 8 (sublane), capped so 2 inputs x 2 buffers stay tiny in VMEM.
    tn = min(_round_up(max_tile_n, 8), _round_up(n, 8))
    n_pad = _round_up(n, tn)

    y2 = jnp.reshape(y, (n, 1))
    if n_pad != n:
        output1 = jnp.pad(output1, ((0, n_pad - n), (0, 0)))
        output2 = jnp.pad(output2, ((0, n_pad - n), (0, 0)))
        y2 = jnp.pad(y2, ((0, n_pad - n), (0, 0)))

    grid = (n_pad // tn,)

    itemsize = jnp.dtype(output1.dtype).itemsize
    # 2 input tiles + y tile, double-buffered, with generous headroom; capped well
    # below v7x's 64 MiB physical VMEM.
    vmem_bytes = int(min(48 * 1024 * 1024,
                         max(16 * 1024 * 1024,
                             8 * tn * (2 * feat * itemsize + 4))))

    out = pl.pallas_call(
        functools.partial(_contrastive_loss_kernel,
                          margin=float(margin), n_total=n, tile_n=tn),
        out_shape=jax.ShapeDtypeStruct((1, 1), jnp.float32),
        grid=grid,
        in_specs=[
            pl.BlockSpec((tn, feat), lambda i: (i, 0)),
            pl.BlockSpec((tn, feat), lambda i: (i, 0)),
            pl.BlockSpec((tn, 1), lambda i: (i, 0)),
        ],
        out_specs=pl.BlockSpec((1, 1), lambda i: (0, 0)),  # same block every step => resident accumulator
        compiler_params=pltpu.CompilerParams(
            dimension_semantics=("arbitrary",),  # reduction axis
            vmem_limit_bytes=vmem_bytes,
        ),
    )(output1, output2, y2)
    return out[0, 0]


def _reference(output1, output2, y, margin=2.0):
    # Pure-JAX reference mirroring the PyTorch module exactly.
    d = jnp.sqrt(jnp.sum((output1.astype(jnp.float32)
                          - output2.astype(jnp.float32) + _EPS) ** 2, axis=-1))
    hinge = jnp.clip(margin - d, 0.0, jnp.inf)
    return jnp.mean((1.0 - y) * d**2 + y * hinge**2)


if __name__ == "__main__":
    key = jax.random.PRNGKey(0)
    k1, k2, k3 = jax.random.split(key, 3)

    # Small synthetic embedding batch, as implied by the module.
    N, D = 8, 32
    output1 = jax.random.normal(k1, (N, D), dtype=jnp.float32)
    output2 = jax.random.normal(k2, (N, D), dtype=jnp.float32)
    y = jax.random.bernoulli(k3, 0.5, (N,)).astype(jnp.float32)  # 0 = similar, 1 = dissimilar

    loss = jax.block_until_ready(contrastive_loss(output1, output2, y, margin=2.0))
    ref = _reference(output1, output2, y, margin=2.0)
    assert jnp.allclose(loss, ref, rtol=1e-5, atol=1e-5), (loss, ref)

    # Second case: exercises the grid / tail-masking path (N not a multiple of the tile).
    k4, k5, k6 = jax.random.split(jax.random.PRNGKey(1), 3)
    N2, D2 = 37, 32
    a1 = jax.random.normal(k4, (N2, D2), dtype=jnp.float32)
    a2 = jax.random.normal(k5, (N2, D2), dtype=jnp.float32)
    yy = jax.random.bernoulli(k6, 0.5, (N2,)).astype(jnp.float32)

    loss2 = jax.block_until_ready(contrastive_loss(a1, a2, yy, margin=2.0, max_tile_n=16))
    ref2 = _reference(a1, a2, yy, margin=2.0)
    assert jnp.allclose(loss2, ref2, rtol=1e-5, atol=1e-5), (loss2, ref2)

    print("KERNEL_OK")
</pallas_src>

<mosaic_0001>
module attributes {stable_mosaic.version = 11 : i64} {
  func.func @_contrastive_loss_kernel(%arg0: i32, %arg1: memref<8x32xf32, #tpu.memory_space<vmem>>, %arg2: memref<8x32xf32, #tpu.memory_space<vmem>>, %arg3: memref<8x1xf32, #tpu.memory_space<vmem>>, %arg4: memref<1x1xf32, #tpu.memory_space<vmem>>) attributes {dimension_semantics = [#tpu.dimension_semantics<arbitrary>], iteration_bounds = array<i64: 1>, scalar_prefetch = 0 : i64, scratch_operands = 0 : i64, tpu.core_type = #tpu.core_type<tc>, window_params = [{transform_indices = @transform_0, window_bounds = array<i64: 8, 32>}, {transform_indices = @transform_1, window_bounds = array<i64: 8, 32>}, {transform_indices = @transform_2, window_bounds = array<i64: 8, 1>}, {pipeline_mode = #tpu.pipeline_mode<synchronous>, transform_indices = @transform_3, window_bounds = array<i64: 1, 1>}]} {
    %c0_i32 = arith.constant 0 : i32
    %0 = arith.cmpi eq, %arg0, %c0_i32 : i32
    %1 = arith.extui %0 : i1 to i32
    %c0_i32_0 = arith.constant 0 : i32
    %2 = arith.cmpi ne, %1, %c0_i32_0 : i32
    scf.if %2 {
      %cst_19 = arith.constant 0.000000e+00 : f32
      %42 = vector.broadcast %cst_19 : f32 to vector<1x1xf32>
      %c0_20 = arith.constant 0 : index
      %c0_21 = arith.constant 0 : index
      %43 = vector.load %arg4[%c0_20, %c0_21] : memref<1x1xf32, #tpu.memory_space<vmem>>, vector<1x1xf32>
      tpu.vector_store %arg4[%c0_20, %c0_21], %42 {strides = array<i32>} : memref<1x1xf32, #tpu.memory_space<vmem>>, vector<1x1xf32>,
    } else {
    }
    %c0 = arith.constant 0 : index
    %c0_1 = arith.constant 0 : index
    %3 = vector.load %arg1[%c0, %c0_1] : memref<8x32xf32, #tpu.memory_space<vmem>>, vector<8x32xf32>
    %c0_2 = arith.constant 0 : index
    %c0_3 = arith.constant 0 : index
    %4 = vector.load %arg2[%c0_2, %c0_3] : memref<8x32xf32, #tpu.memory_space<vmem>>, vector<8x32xf32>
    %c0_4 = arith.constant 0 : index
    %c0_5 = arith.constant 0 : index
    %5 = vector.load %arg3[%c0_4, %c0_5] : memref<8x1xf32, #tpu.memory_space<vmem>>, vector<8x1xf32>
    %6 = arith.subf %3, %4 : vector<8x32xf32>
    %cst = arith.constant 9.99999997E-7 : f32
    %7 = vector.broadcast %cst : f32 to vector<8x32xf32>
    %8 = arith.addf %6, %7 : vector<8x32xf32>
    %9 = arith.mulf %8, %8 : vector<8x32xf32>
    %cst_6 = arith.constant dense<0.000000e+00> : vector<8xf32>
    %10 = vector.multi_reduction <add>, %9, %cst_6 [1] : vector<8x32xf32> to vector<8xf32>
    %11 = vector.shape_cast %10 : vector<8xf32> to vector<8x1xf32>
    %12 = math.sqrt %11 : vector<8x1xf32>
    %cst_7 = arith.constant 2.000000e+00 : f32
    %13 = vector.broadcast %cst_7 : f32 to vector<8x1xf32>
    %14 = arith.subf %13, %12 : vector<8x1xf32>
    %cst_8 = arith.constant 0.000000e+00 : f32
    %15 = vector.broadcast %cst_8 : f32 to vector<8x1xf32>
    %16 = arith.maximumf %14, %15 : vector<8x1xf32>
    %cst_9 = arith.constant 1.000000e+00 : f32
    %17 = vector.broadcast %cst_9 : f32 to vector<8x1xf32>
    %18 = arith.subf %17, %5 : vector<8x1xf32>
    %19 = arith.mulf %18, %11 : vector<8x1xf32>
    %20 = arith.mulf %16, %16 : vector<8x1xf32>
    %21 = arith.mulf %5, %20 : vector<8x1xf32>
    %22 = arith.addf %19, %21 : vector<8x1xf32>
    %c8_i32 = arith.constant 8 : i32
    %23 = arith.muli %arg0, %c8_i32 : i32
    %24 = tpu.iota {dimensions = array<i32: 0>} : vector<8x1xi32>
    %25 = vector.broadcast %23 : i32 to vector<8x1xi32>
    %26 = arith.addi %25, %24 : vector<8x1xi32>
    %c8_i32_10 = arith.constant 8 : i32
    %27 = vector.broadcast %c8_i32_10 : i32 to vector<8x1xi32>
    %28 = arith.cmpi slt, %26, %27 : vector<8x1xi32>
    %cst_11 = arith.constant 0.000000e+00 : f32
    %29 = vector.broadcast %cst_11 : f32 to vector<8x1xf32>
    %30 = arith.select %28, %22, %29 : vector<8x1xi1>, vector<8x1xf32>
    %c0_12 = arith.constant 0 : index
    %c0_13 = arith.constant 0 : index
    %31 = vector.load %arg4[%c0_12, %c0_13] : memref<1x1xf32, #tpu.memory_space<vmem>>, vector<1x1xf32>
    %32 = vector.shape_cast %30 : vector<8x1xf32> to vector<1x8x1xf32>
    %cst_14 = arith.constant dense<0.000000e+00> : vector<1xf32>
    %33 = vector.multi_reduction <add>, %32, %cst_14 [1, 2] : vector<1x8x1xf32> to vector<1xf32>
    %34 = vector.shape_cast %33 : vector<1xf32> to vector<1x1x1xf32>
    %35 = vector.extract %34[0, 0, 0] : f32 from vector<1x1x1xf32>
    %36 = vector.broadcast %35 : f32 to vector<1x1xf32>
    %37 = arith.addf %31, %36 : vector<1x1xf32>
    %c0_15 = arith.constant 0 : index
    %c0_16 = arith.constant 0 : index
    %38 = vector.load %arg4[%c0_15, %c0_16] : memref<1x1xf32, #tpu.memory_space<vmem>>, vector<1x1xf32>
    tpu.vector_store %arg4[%c0_15, %c0_16], %37 {strides = array<i32>} : memref<1x1xf32, #tpu.memory_space<vmem>>, vector<1x1xf32>,
    %c0_i32_17 = arith.constant 0 : i32
    %39 = arith.cmpi eq, %arg0, %c0_i32_17 : i32
    %40 = arith.extui %39 : i1 to i32
    %c0_i32_18 = arith.constant 0 : i32
    %41 = arith.cmpi ne, %40, %c0_i32_18 : i32
    scf.if %41 {
      %c0_19 = arith.constant 0 : index
      %c0_20 = arith.constant 0 : index
      %42 = vector.load %arg4[%c0_19, %c0_20] : memref<1x1xf32, #tpu.memory_space<vmem>>, vector<1x1xf32>
      %cst_21 = arith.constant 1.250000e-01 : f32
      %43 = vector.broadcast %cst_21 : f32 to vector<1x1xf32>
      %44 = arith.mulf %42, %43 : vector<1x1xf32>
      %c0_22 = arith.constant 0 : index
      %c0_23 = arith.constant 0 : index
      %45 = vector.load %arg4[%c0_22, %c0_23] : memref<1x1xf32, #tpu.memory_space<vmem>>, vector<1x1xf32>
      tpu.vector_store %arg4[%c0_22, %c0_23], %44 {strides = array<i32>} : memref<1x1xf32, #tpu.memory_space<vmem>>, vector<1x1xf32>,
    } else {
    }
    return
  }
  func.func @transform_0(%arg0: i32) -> (i32, i32) {
    %c0_i32 = arith.constant 0 : i32
    %c0_i32_0 = arith.constant 0 : i32
    return %arg0, %c0_i32 : i32, i32
  }
  func.func @transform_1(%arg0: i32) -> (i32, i32) {
    %c0_i32 = arith.constant 0 : i32
    %c0_i32_0 = arith.constant 0 : i32
    return %arg0, %c0_i32 : i32, i32
  }
  func.func @transform_2(%arg0: i32) -> (i32, i32) {
    %c0_i32 = arith.constant 0 : i32
    %c0_i32_0 = arith.constant 0 : i32
    return %arg0, %c0_i32 : i32, i32
  }
  func.func @transform_3(%arg0: i32) -> (i32, i32) {
    %c0_i32 = arith.constant 0 : i32
    %c0_i32_0 = arith.constant 0 : i32
    %c0_i32_1 = arith.constant 0 : i32
    return %c0_i32, %c0_i32_0 : i32, i32
  }
}

</mosaic_0001>

<bundles_post_ra>
// kernel: tpu_custom_call.1
= control target key start
LH: loop header
LB: loop body
LE: loop exit
PB: predicated region body
PF: predicated region fallthrough
CT: control target
= control target key end

     0   :  { %8 = vsyncpa [#allocation3], 0  ;;  %s212_s0 = inlined_call_operand.vmem [shape: f32[8,32], index: 0, kind: input, shape index: {}]   ;;  %s213_s1 = inlined_call_operand.hbm [shape: f32[8,32], index: 1, kind: input, shape index: {}]   ;;  %s214_s2 = inlined_call_operand.vmem [shape: f32[8,1], index: 2, kind: input, shape index: {}]   ;;  %s215_s3 = inlined_call_operand.hbm [shape: f32[1,1], index: 3, kind: output, shape index: {}]  }
   0x1   :  { %9 = vsyncpa [#allocation4], 0  ;;  %s156_s12 = smov [#allocation2]   ;;  %s108_s16 = scalar_lea.hbm %s213_s1, 128 }
   0x2   :  { %s18_s13 = sshll.u32 %s156_s12, 4  ;;  %p109_p0 = scmp.ne.s32.totalorder %s213_s1, %s108_s16  ;;  %s19_s13 = int_to_ptr.vmem [resolvable:$true] %s18_s13 }
   0x3   :  { %p112_p1 = scmp.lt.u32.totalorder %s108_s16, %s213_s1 }
   0x5   :  { %p114_p2 = pnand %p112_p1, %p109_p0 }
   0x7   :  { %117 = shalt.err (!%p114_p2)
}
   0x8   :  { %s118_s21 = scalar_lea.vmem %s19_s13, 128  ;;  %p123_p4 = scmp.lt.s32.totalorder %s19_s13, %s19_s13 }
   0x9   :  { %p119_p3 = scmp.ne.s32.totalorder %s19_s13, %s118_s21  ;;  %p124_p5 = scmp.lt.s32.totalorder %s118_s21, %s118_s21 }
   0xb   :  { %p125_p6 = por %p124_p5, %p123_p4 }
   0xd   :  { %p126_p7 = pnand %p125_p6, %p119_p3 }
   0xf   :  { %129 = shalt.err (!%p126_p7)
}
  0x10   :  { %21 = dma.hbm_to_vmem [thread:$0]  %s213_s1, 128, %s19_s13, [#allocation3]  }
  0x11   :  { %152 = dma.done.wait [#allocation3], 128  }
  0x12   :  { %153 = vsyncadd [#allocation3], 4294967168  ;;  %v33_v0 = vld [vmem:[%s212_s0] sm:$0xff]  ;;  %vm39_vm0 = vcmask 261120   ;;  %vm65_vm3 = vcmask 7168   ;;  %vm31_vm4 = vcmask 0  }
  0x13   :  { %v34_v1 = vld [vmem:[#allocation2] sm:$0xff]  ;;  %v157_v21 = vmov 0.0  }
  0x14   :  { %v36_v2 = vsub.f32 %v33_v0, %v34_v1  ;;  %v35_v11 = vld [vmem:[%s214_s2] sm:$0xff]  ;;  %32 = vst.msk [vmem:[#allocation5] sm:$0x1] %vm31_vm4, %v157_v21  ;;  %s158_s2 = smov [#allocation5]  }
  0x15   :  { %v52_v15 = vsub.f32 1.0, %v35_v11  ;;  %s92_s27 = sshll.u32 %s158_s2, 4  ;;  %s93_s27 = int_to_ptr.vmem [resolvable:$true] %s92_s27 }
  0x16   :  { %v37_v3 = vadd.f32 1e-06, %v36_v2  ;;  %s130_s28 = scalar_lea.vmem %s93_s27, 16  ;;  %s134_s29 = scalar_lea.vmem %s93_s27, 32 }
  0x17   :  { %p131_p8 = scmp.ne.s32.totalorder %s93_s27, %s130_s28  ;;  %p135_p9 = scmp.lt.s32.totalorder %s93_s27, %s93_s27 }
  0x18   :  { %v38_v4 = vmul.f32 %v37_v3, %v37_v3  ;;  %p136_p10 = scmp.lt.s32.totalorder %s134_s29, %s130_s28 }
  0x1a   :  { %v40_v5 = vsel %vm39_vm0, %v38_v4, 0.0  ;;  %p137_p11 = por %p136_p10, %p135_p9 }
  0x1b   :  { %41 = vadd.xlane.f32.xlu0 %v40_v5  ;;  %v64_v29 = vld [vmem:[#allocation5] sm:$0x1] }
  0x1c   :  { %p138_p12 = pnand %p137_p11, %p131_p8 }
  0xa8   :  { %v42_v6 = vpop.xlane.xlu0 %41 }
  0xa9   :  { %106 = vrsqrt.f32 %v42_v6  ;;  %vm45_vm1 = vcmp.eq.f32.partialorder %v42_v6, inf  ;;  %v48_v9 = vand.u32 2147483648, %v42_v6  ;;  %vm47_vm2 = vcmp.eq.f32.partialorder %v42_v6, 0.0 }
  0xaa   :  { %v53_v17 = vmul.f32 %v52_v15, %v42_v6 }
  0xb3   :  { %v107_v7 = vpop.eup %106 }
  0xb4   :  { %v44_v8 = vmul.f32 %v107_v7, %v42_v6 }
  0xb6   :  { %v46_v10 = vsel %vm45_vm1, %v42_v6, %v44_v8 }
  0xb7   :  { %v49_v12 = vsel %vm47_vm2, %v48_v9, %v46_v10 }
  0xb8   :  { %v50_v13 = vsub.f32 2.0, %v49_v12 }
  0xba   :  { %v51_v14 = vmax.f32 %v50_v13, 0.0 }
  0xbc   :  { %v54_v16 = vmul.f32 %v51_v14, %v51_v14 }
  0xbe   :  { %v55_v18 = vmul.f32 %v54_v16, %v35_v11 }
  0xc0   :  { %v56_v19 = vadd.f32 %v55_v18, %v53_v17 }
  0xc2   :  { %v66_v20 = vsel %vm65_vm3, %v56_v19, 0.0 }
  0xc3   :  { %67 = vadd.xlane.f32.xlu0 %v66_v20 }
 0x150   :  { %v68_v22 = vpop.xlane.xlu0 %67 }
 0x151   :  { %v69_v23 = vrot.slane %v68_v22, 4 }
 0x153   :  { %v70_v24 = vadd.f32 %v69_v23, %v68_v22 }
 0x155   :  { %v71_v25 = vrot.slane %v70_v24, 2 }
 0x157   :  { %v72_v26 = vadd.f32 %v71_v25, %v70_v24 }
 0x159   :  { %v73_v27 = vrot.slane %v72_v26, 1 }
 0x15b   :  { %v74_v28 = vadd.f32 %v73_v27, %v72_v26 }
 0x15d   :  { %101 = vpush %v74_v28 }
 0x18e   :  { %s102_s0 = spop %101 }
 0x18f   :  { %v76_v30 = vstv %s102_s0 }
 0x190   :  { %v77_v31 = vadd.f32 %v76_v30, %v64_v29 }
 0x192   :  { %79 = vst.msk [vmem:[#allocation5] sm:$0x1] %vm31_vm4, %v77_v31 }
 0x199   :  { %v83_v32 = vld [vmem:[#allocation5] sm:$0x1] }
 0x19a   :  { %v84_v33 = vmul.f32 0.125, %v83_v32 }
 0x19c   :  { %85 = vst.msk [vmem:[#allocation5] sm:$0x1] %vm31_vm4, %v84_v33 }
 0x19d   :  { %141 = shalt.err (!%p138_p12)
}
 0x19e   :  { %s142_s5 = scalar_lea.hbm %s215_s3, 16 }
 0x19f   :  { %p143_p13 = scmp.ne.s32.totalorder %s215_s3, %s142_s5  ;;  %p146_p0 = scmp.lt.u32.totalorder %s142_s5, %s215_s3 }
 0x1a1   :  { %p148_p1 = pnand %p146_p0, %p143_p13 }
 0x1a3   :  { %151 = shalt.err (!%p148_p1)
}
 0x1a4   :  { %95 = dma.vmem_to_hbm [thread:$0]  %s93_s27, 16, %s215_s3, [#allocation4]  }
 0x1a5   :  { %154 = dma.done.wait [#allocation4], 16  }
 0x1a6   :  { %155 = vsyncadd [#allocation4], 4294967280 }
 0x1a7   :  { %99 = vsyncpa [#allocation3], 1 }
 0x1a8   :  { %100 = vsyncpa [#allocation4], 1 }

</bundles_post_ra>
